<compile_context>
chip_gen: v5e
topology: v5e:2x2
jax: 0.10.0
libtpu: 0.0.40
codegen_flags: <defaults>
</compile_context>

<pallas_src>
import functools
import math

import jax
import jax.numpy as jnp
from jax.experimental import pallas as pl
from jax.experimental.pallas import tpu as pltpu

EPS = 1e-5  # PyTorch GroupNorm default eps


def _gn_relu_kernel(x_ref, gamma_ref, beta_ref, o_ref, *, true_l, gp):
    """GroupNorm (per-row reduce) + per-channel affine + ReLU.

    x_ref, o_ref        : (rpt, Lp)  streamed activation tiles (lane-padded)
    gamma_ref, beta_ref : (gp, Lp)   tiny resident affine pattern; rows cycle
                                     through the groups and rpt % gp == 0.
    """
    x = x_ref[...].astype(jnp.float32)               # (rpt, Lp)
    rpt, lp = x.shape
    inv_n = jnp.float32(1.0 / true_l)                # stats over TRUE row length

    # One-pass statistics (pad lanes are zero, so they do not perturb sums).
    s = jnp.sum(x, axis=-1, keepdims=True)
    ss = jnp.sum(x * x, axis=-1, keepdims=True)
    mean = s * inv_n
    var = jnp.maximum(ss * inv_n - mean * mean, 0.0)  # clamp cancellation
    inv = jax.lax.rsqrt(var + EPS)                    # (rpt, 1)

    xn = (x - mean) * inv                             # normalized rows

    # Affine: broadcast the (gp, Lp) pattern over rpt // gp row-blocks.
    # gp is a multiple of the sublane packing, so the reshape is tile-aligned.
    g = gamma_ref[...]                                # float32 (gp, Lp)
    b = beta_ref[...]
    y = xn.reshape(rpt // gp, gp, lp) * g + b         # broadcast leading axis
    y = jnp.maximum(y, 0.0).reshape(rpt, lp)
    o_ref[...] = y.astype(o_ref.dtype)


def _round_up(x, m):
    return (x + m - 1) // m * m


def base_op_forward(x_nchw, gamma, beta, num_groups, tile_cap_bytes=None):
    """BaseOp.forward with default config (weight_call = identity).

    x_nchw : (N, C, H, W);  gamma, beta : (C,) GroupNorm affine params.
    """
    N, C, H, W = x_nchw.shape
    G = num_groups
    assert C % G == 0
    cpg = C // G
    hw = H * W
    L = cpg * hw            # elements per (sample, group) row
    R = N * G               # total rows

    # TODO(synk): BaseOp.weight_call is abstract (raises NotImplementedError);
    # treated as identity here, which requires in_channels == out_channels.
    x2 = x_nchw.reshape(R, L)           # lane-dense view: one group-row per row
    itemsize = x2.dtype.itemsize

    # ---- layout parameters --------------------------------------------------
    Lp = _round_up(L, 128)              # lane-aligned row length (full vst)
    pack = 8 * max(1, 4 // itemsize)    # dtype-aware sublane multiple (8/16/32)
    Gp = math.lcm(G, pack)              # affine-pattern height

    # ---- generation-aware VMEM budget ---------------------------------------
    try:
        vmem_cap = int(pltpu.get_tpu_info().vmem_capacity_bytes)
    except Exception:
        vmem_cap = 64 * 1024 * 1024
    vmem_limit = (vmem_cap * 3) // 4
    if tile_cap_bytes is None:
        # live set ~= 2x(in)+2x(out) pipeline buffers + a few f32 temps
        tile_cap_bytes = min(vmem_limit // 12, 8 * 1024 * 1024)

    row_bytes = Lp * itemsize
    rows_fit = max(Gp, (tile_cap_bytes // row_bytes) // Gp * Gp)
    rpt = min(rows_fit, _round_up(R, Gp))     # rows per tile, multiple of Gp
    R_pad = _round_up(R, rpt)

    # Fail loudly if even the minimal (Gp-row) tile cannot fit physical VMEM.
    min_bytes = 4 * Gp * row_bytes + 2 * Gp * Lp * 4 + 3 * Gp * Lp * 4
    if min_bytes > vmem_cap:
        # TODO(synk): add a second 'arbitrary' grid axis over L with VMEM
        # scratch accumulators for shapes whose single group-row exceeds VMEM.
        raise ValueError(
            f"single group-row working set ({min_bytes} B) exceeds VMEM "
            f"capacity ({vmem_cap} B); L-split path not implemented")
    vmem_limit = min(vmem_cap,
                     max(vmem_limit,
                         4 * rpt * row_bytes + 2 * Gp * Lp * 4 + (8 << 20)))

    # Pad rows / lanes only when needed (costs one extra pass over x).
    if (R_pad != R) or (Lp != L):
        x2 = jnp.pad(x2, ((0, R_pad - R), (0, Lp - L)))

    # Tiny resident affine pattern (Gp, Lp): rows cycle through the G groups,
    # each row is cpg blocks of H*W identical values; independent of N.
    gamma_row = jnp.broadcast_to(
        gamma.astype(jnp.float32).reshape(G, cpg, 1), (G, cpg, hw)).reshape(G, L)
    beta_row = jnp.broadcast_to(
        beta.astype(jnp.float32).reshape(G, cpg, 1), (G, cpg, hw)).reshape(G, L)
    gamma_t = jnp.tile(gamma_row, (Gp // G, 1))
    beta_t = jnp.tile(beta_row, (Gp // G, 1))
    if Lp != L:
        gamma_t = jnp.pad(gamma_t, ((0, 0), (0, Lp - L)))
        beta_t = jnp.pad(beta_t, ((0, 0), (0, Lp - L)))

    grid = (R_pad // rpt,)
    kernel = functools.partial(_gn_relu_kernel, true_l=L, gp=Gp)

    out = pl.pallas_call(
        kernel,
        out_shape=jax.ShapeDtypeStruct((R_pad, Lp), x_nchw.dtype),
        grid_spec=pltpu.PrefetchScalarGridSpec(
            num_scalar_prefetch=0,
            grid=grid,
            in_specs=[
                pl.BlockSpec((rpt, Lp), lambda i: (i, 0)),   # x: streamed
                pl.BlockSpec((Gp, Lp), lambda i: (0, 0)),    # gamma: tiny, resident
                pl.BlockSpec((Gp, Lp), lambda i: (0, 0)),    # beta : tiny, resident
            ],
            out_specs=pl.BlockSpec((rpt, Lp), lambda i: (i, 0)),
        ),
        compiler_params=pltpu.CompilerParams(
            # TODO(synk): on v7x consider pltpu.CORE_PARALLEL on this axis so the
            # row stream is explicitly split across both TensorCores.
            dimension_semantics=("parallel",),   # rows are independent
            vmem_limit_bytes=int(vmem_limit),
        ),
    )(x2, gamma_t, beta_t)

    if (R_pad != R) or (Lp != L):
        out = out[:R, :L]
    return out.reshape(N, C, H, W)


def _reference(x_nchw, gamma, beta, num_groups):
    N, C, H, W = x_nchw.shape
    G = num_groups
    cpg = C // G
    xr = x_nchw.astype(jnp.float32).reshape(N, G, cpg, H, W)
    mean = jnp.mean(xr, axis=(2, 3, 4), keepdims=True)
    var = jnp.mean((xr - mean) ** 2, axis=(2, 3, 4), keepdims=True)
    y = (xr - mean) / jnp.sqrt(var + EPS)
    y = y.reshape(N, C, H, W)
    y = y * gamma.reshape(1, C, 1, 1) + beta.reshape(1, C, 1, 1)
    return jnp.maximum(y, 0.0)


if __name__ == "__main__":
    key = jax.random.PRNGKey(0)
    k1, k2, k3 = jax.random.split(key, 3)

    # BaseOp(in_channels=4, out_channels=4) defaults:
    # group = out_channels // 2 = 2 -> GroupNorm(2, 4, affine=True) + ReLU
    N, C, H, W = 2, 4, 16, 16
    G = C // 2
    x = jax.random.normal(k1, (N, C, H, W), dtype=jnp.float32)
    gamma = 1.0 + 0.1 * jnp.arange(C, dtype=jnp.float32)
    beta = 0.05 * jnp.arange(C, dtype=jnp.float32)
    out = jax.block_until_ready(base_op_forward(x, gamma, beta, G))
    ref = _reference(x, gamma, beta, G)
    assert out.shape == (N, C, H, W)
    assert jnp.max(jnp.abs(out - ref)) < 1e-4

    # Multi-tile grid: force a small tile cap to exercise the streaming path
    # and the repeating (Gp, L) affine pattern across tiles.
    N2, C2, H2, W2 = 4, 8, 16, 16
    G2 = C2 // 2
    x2 = jax.random.normal(k2, (N2, C2, H2, W2), dtype=jnp.float32)
    gamma2 = jnp.linspace(0.5, 1.5, C2, dtype=jnp.float32)
    beta2 = jnp.linspace(-0.2, 0.2, C2, dtype=jnp.float32)
    out2 = jax.block_until_ready(
        base_op_forward(x2, gamma2, beta2, G2, tile_cap_bytes=16 * 1024))
    ref2 = _reference(x2, gamma2, beta2, G2)
    assert jnp.max(jnp.abs(out2 - ref2)) < 1e-4

    # Non-128-aligned row length (7x7 feature map): exercises lane padding and
    # the true-L statistics path.
    N3, C3, H3, W3 = 2, 4, 7, 7
    G3 = C3 // 2
    x3 = jax.random.normal(k3, (N3, C3, H3, W3), dtype=jnp.float32)
    gamma3 = 1.0 + 0.05 * jnp.arange(C3, dtype=jnp.float32)
    beta3 = -0.1 + 0.05 * jnp.arange(C3, dtype=jnp.float32)
    out3 = jax.block_until_ready(base_op_forward(x3, gamma3, beta3, G3))
    ref3 = _reference(x3, gamma3, beta3, G3)
    assert jnp.max(jnp.abs(out3 - ref3)) < 1e-4

    print("KERNEL_OK")
</pallas_src>

<mosaic_0001>
module attributes {stable_mosaic.version = 11 : i64} {
  func.func @_gn_relu_kernel(%arg0: i32, %arg1: memref<8x512xf32, #tpu.memory_space<vmem>>, %arg2: memref<8x512xf32, #tpu.memory_space<vmem>>, %arg3: memref<8x512xf32, #tpu.memory_space<vmem>>, %arg4: memref<8x512xf32, #tpu.memory_space<vmem>>) attributes {dimension_semantics = [#tpu.dimension_semantics<parallel>], iteration_bounds = array<i64: 1>, scalar_prefetch = 0 : i64, scratch_operands = 0 : i64, tpu.core_type = #tpu.core_type<tc>, window_params = [{transform_indices = @transform_0, window_bounds = array<i64: 8, 512>}, {pipeline_mode = #tpu.pipeline_mode<synchronous>, transform_indices = @transform_1, window_bounds = array<i64: 8, 512>}, {pipeline_mode = #tpu.pipeline_mode<synchronous>, transform_indices = @transform_2, window_bounds = array<i64: 8, 512>}, {transform_indices = @transform_3, window_bounds = array<i64: 8, 512>}]} {
    %c0 = arith.constant 0 : index
    %c0_0 = arith.constant 0 : index
    %0 = vector.load %arg1[%c0, %c0_0] : memref<8x512xf32, #tpu.memory_space<vmem>>, vector<8x512xf32>
    %cst = arith.constant dense<0.000000e+00> : vector<8xf32>
    %1 = vector.multi_reduction <add>, %0, %cst [1] : vector<8x512xf32> to vector<8xf32>
    %2 = vector.shape_cast %1 : vector<8xf32> to vector<8x1xf32>
    %3 = arith.mulf %0, %0 : vector<8x512xf32>
    %cst_1 = arith.constant dense<0.000000e+00> : vector<8xf32>
    %4 = vector.multi_reduction <add>, %3, %cst_1 [1] : vector<8x512xf32> to vector<8xf32>
    %5 = vector.shape_cast %4 : vector<8xf32> to vector<8x1xf32>
    %cst_2 = arith.constant 0.001953125 : f32
    %6 = vector.broadcast %cst_2 : f32 to vector<8x1xf32>
    %7 = arith.mulf %2, %6 : vector<8x1xf32>
    %cst_3 = arith.constant 0.001953125 : f32
    %8 = vector.broadcast %cst_3 : f32 to vector<8x1xf32>
    %9 = arith.mulf %5, %8 : vector<8x1xf32>
    %10 = arith.mulf %7, %7 : vector<8x1xf32>
    %11 = arith.subf %9, %10 : vector<8x1xf32>
    %cst_4 = arith.constant 0.000000e+00 : f32
    %12 = vector.broadcast %cst_4 : f32 to vector<8x1xf32>
    %13 = arith.maximumf %11, %12 : vector<8x1xf32>
    %cst_5 = arith.constant 9.99999974E-6 : f32
    %14 = vector.broadcast %cst_5 : f32 to vector<8x1xf32>
    %15 = arith.addf %13, %14 : vector<8x1xf32>
    %16 = math.rsqrt %15 : vector<8x1xf32>
    %17 = vector.broadcast %7 : vector<8x1xf32> to vector<8x512xf32>
    %18 = arith.subf %0, %17 : vector<8x512xf32>
    %19 = vector.broadcast %16 : vector<8x1xf32> to vector<8x512xf32>
    %20 = arith.mulf %18, %19 : vector<8x512xf32>
    %c0_6 = arith.constant 0 : index
    %c0_7 = arith.constant 0 : index
    %21 = vector.load %arg2[%c0_6, %c0_7] : memref<8x512xf32, #tpu.memory_space<vmem>>, vector<8x512xf32>
    %c0_8 = arith.constant 0 : index
    %c0_9 = arith.constant 0 : index
    %22 = vector.load %arg3[%c0_8, %c0_9] : memref<8x512xf32, #tpu.memory_space<vmem>>, vector<8x512xf32>
    %23 = vector.shape_cast %20 : vector<8x512xf32> to vector<1x8x512xf32>
    %24 = vector.shape_cast %21 : vector<8x512xf32> to vector<1x8x512xf32>
    %25 = arith.mulf %23, %24 : vector<1x8x512xf32>
    %26 = vector.shape_cast %22 : vector<8x512xf32> to vector<1x8x512xf32>
    %27 = arith.addf %25, %26 : vector<1x8x512xf32>
    %cst_10 = arith.constant 0.000000e+00 : f32
    %28 = vector.broadcast %cst_10 : f32 to vector<1x8x512xf32>
    %29 = arith.maximumf %27, %28 : vector<1x8x512xf32>
    %30 = vector.shape_cast %29 : vector<1x8x512xf32> to vector<8x512xf32>
    %c0_11 = arith.constant 0 : index
    %c0_12 = arith.constant 0 : index
    %31 = vector.load %arg4[%c0_11, %c0_12] : memref<8x512xf32, #tpu.memory_space<vmem>>, vector<8x512xf32>
    tpu.vector_store %arg4[%c0_11, %c0_12], %30 {strides = array<i32>} : memref<8x512xf32, #tpu.memory_space<vmem>>, vector<8x512xf32>,
    return
  }
  func.func @transform_0(%arg0: i32) -> (i32, i32) {
    %c0_i32 = arith.constant 0 : i32
    %c0_i32_0 = arith.constant 0 : i32
    return %arg0, %c0_i32 : i32, i32
  }
  func.func @transform_1(%arg0: i32) -> (i32, i32) {
    %c0_i32 = arith.constant 0 : i32
    %c0_i32_0 = arith.constant 0 : i32
    %c0_i32_1 = arith.constant 0 : i32
    return %c0_i32, %c0_i32_0 : i32, i32
  }
  func.func @transform_2(%arg0: i32) -> (i32, i32) {
    %c0_i32 = arith.constant 0 : i32
    %c0_i32_0 = arith.constant 0 : i32
    %c0_i32_1 = arith.constant 0 : i32
    return %c0_i32, %c0_i32_0 : i32, i32
  }
  func.func @transform_3(%arg0: i32) -> (i32, i32) {
    %c0_i32 = arith.constant 0 : i32
    %c0_i32_0 = arith.constant 0 : i32
    return %arg0, %c0_i32 : i32, i32
  }
}

</mosaic_0001>

<bundles_post_ra>
// kernel: tpu_custom_call.1
= control target key start
LH: loop header
LB: loop body
LE: loop exit
PB: predicated region body
PF: predicated region fallthrough
CT: control target
= control target key end

     0   :  { %8 = vsyncpa [#allocation3], 0  ;;  %s284_s0 = inlined_call_operand.hbm [shape: f32[8,512], index: 0, kind: input, shape index: {}]   ;;  %s285_s1 = inlined_call_operand.hbm [shape: f32[8,512], index: 1, kind: input, shape index: {}]   ;;  %s286_s2 = inlined_call_operand.hbm [shape: f32[8,512], index: 2, kind: input, shape index: {}]   ;;  %s287_s3 = inlined_call_operand.hbm [shape: f32[8,512], index: 3, kind: output, shape index: {}]  }
   0x1   :  { %9 = vsyncpa [#allocation6], 0  ;;  %s27_s14 = sshll.u32 %s285_s1, 4  ;;  %s28_s14 = int_to_ptr.hbm [resolvable:$true] %s27_s14 }
   0x2   :  { %10 = vsyncpa [#allocation4], 0  ;;  %s248_s15 = smov [#allocation5]   ;;  %s16_s19 = sshll.u32 %s284_s0, 4  ;;  %s17_s19 = int_to_ptr.hbm [resolvable:$true] %s16_s19 }
   0x3   :  { %s29_s16 = sshll.u32 %s248_s15, 4  ;;  %s249_s20 = smov [#allocation2]   ;;  %s30_s16 = int_to_ptr.vmem [resolvable:$true] %s29_s16 }
   0x4   :  { %32 = dma.hbm_to_vmem [thread:$0]  %s28_s14, 512, %s30_s16, [#allocation6]  }
   0x5   :  { %s18_s21 = sshll.u32 %s249_s20, 4  ;;  %s38_s24 = sshll.u32 %s286_s2, 4  ;;  %s19_s21 = int_to_ptr.vmem [resolvable:$true] %s18_s21  ;;  %s39_s24 = int_to_ptr.hbm [resolvable:$true] %s38_s24 }
   0x6   :  { %21 = dma.hbm_to_vmem [thread:$0]  %s17_s19, 512, %s19_s21, [#allocation3]  }
   0x7   :  { %s250_s1 = smov [#allocation7]  }
   0x8   :  { %s40_s25 = sshll.u32 %s250_s1, 4  ;;  %s41_s25 = int_to_ptr.vmem [resolvable:$true] %s40_s25 }
   0x9   :  { %43 = dma.hbm_to_vmem [thread:$0]  %s39_s24, 512, %s41_s25, [#allocation6]  }
   0xa   :  { %242 = dma.done.wait [#allocation3], 512  }
   0xb   :  { %243 = vsyncadd [#allocation3], 4294966784 }
   0xc   :  { %244 = dma.done.wait [#allocation6], 1024  }
   0xd   :  { %245 = vsyncadd [#allocation6], 4294966272  ;;  %v56_v0 = vld [vmem:[#allocation2] sm:$0xff]  ;;  %v57_v1 = vld [vmem:[#allocation2 + $0x8] sm:$0xff]  ;;  %s251_s0 = smov [#allocation8]   ;;  %s129_s28 = sshll.u32 %s287_s3, 4  ;;  %s130_s28 = int_to_ptr.hbm [resolvable:$true] %s129_s28 }
   0xe   :  { %v58_v2 = vld [vmem:[#allocation2 + $0x10] sm:$0xff]  ;;  %v60_v3 = vadd.f32 %v57_v1, %v56_v0  ;;  %v65_v4 = vmul.f32 %v56_v0, %v56_v0  ;;  %v66_v5 = vmul.f32 %v57_v1, %v57_v1  ;;  %v59_v6 = vld [vmem:[#allocation2 + $0x18] sm:$0xff]  ;;  %v98_v32 = vld [vmem:[#allocation5] sm:$0xff]  ;;  %s127_s2 = sshll.u32 %s251_s0, 4  ;;  %s128_s2 = int_to_ptr.vmem [resolvable:$true] %s127_s2 }
   0xf   :  { %v67_v8 = vmul.f32 %v58_v2, %v58_v2  ;;  %v68_v11 = vmul.f32 %v59_v6, %v59_v6  ;;  %v99_v34 = vld [vmem:[#allocation5 + $0x8] sm:$0xff]  ;;  %v100_v35 = vld [vmem:[#allocation5 + $0x10] sm:$0xff]  ;;  %v101_v36 = vld [vmem:[#allocation5 + $0x18] sm:$0xff] }
  0x10   :  { %v61_v7 = vadd.f32 %v60_v3, %v58_v2  ;;  %v69_v9 = vadd.f32 %v66_v5, %v65_v4  ;;  %v102_v41 = vld [vmem:[#allocation7] sm:$0xff]  ;;  %v103_v42 = vld [vmem:[#allocation7 + $0x8] sm:$0xff]  ;;  %v104_v43 = vld [vmem:[#allocation7 + $0x10] sm:$0xff] }
  0x11   :  { %v105_v44 = vld [vmem:[#allocation7 + $0x18] sm:$0xff] }
  0x12   :  { %v62_v10 = vadd.f32 %v61_v7, %v59_v6  ;;  %v70_v12 = vadd.f32 %v69_v9, %v67_v8 }
  0x14   :  { %63 = vadd.xlane.f32.xlu0 %v62_v10  ;;  %v71_v13 = vadd.f32 %v70_v12, %v68_v11 }
  0x1c   :  { %72 = vadd.xlane.f32.xlu0 %v71_v13 }
  0x87   :  { %v64_v14 = vpop.xlane.xlu0 %63 }
  0x88   :  { %v74_v15 = vmul.f32 0.001953125, %v64_v14 }
  0x8a   :  { %v76_v17 = vmul.f32 %v74_v15, %v74_v15  ;;  %v90_v28 = vsub.f32 %v56_v0, %v74_v15  ;;  %v91_v29 = vsub.f32 %v57_v1, %v74_v15  ;;  %v92_v30 = vsub.f32 %v58_v2, %v74_v15 }
  0x8b   :  { %v93_v31 = vsub.f32 %v59_v6, %v74_v15 }
  0x8f   :  { %v73_v16 = vpop.xlane.xlu0 %72 }
  0x90   :  { %v75_v18 = vmul.f32 0.001953125, %v73_v16 }
  0x92   :  { %v77_v19 = vsub.f32 %v75_v18, %v76_v17 }
  0x94   :  { %v78_v20 = vmax.f32 %v77_v19, 0.0 }
  0x96   :  { %v79_v21 = vadd.f32 1e-05, %v78_v20 }
  0x98   :  { %144 = vrsqrt.f32 %v79_v21  ;;  %vm86_vm1 = vweird.f32 %v79_v21 }
  0x9e   :  { %v145_v22 = vpop.eup %144 }
  0x9f   :  { %v81_v23 = vmul.f32 %v145_v22, %v79_v21  ;;  %vm87_vm0 = vweird.f32 %v145_v22 }
  0xa0   :  { %vm88_vm2 = vmor %vm86_vm1, %vm87_vm0 }
  0xa1   :  { %v82_v24 = vmul.f32 %v145_v22, %v81_v23 }
  0xa3   :  { %v83_v25 = vmul.f32 0.5, %v82_v24 }
  0xa5   :  { %v84_v26 = vsub.f32 1.5, %v83_v25 }
  0xa7   :  { %v85_v27 = vmul.f32 %v145_v22, %v84_v26 }
  0xa9   :  { %v89_v33 = vsel %vm88_vm2, %v145_v22, %v85_v27 }
  0xaa   :  { %v94_v37 = vmul.f32 %v90_v28, %v89_v33  ;;  %v95_v38 = vmul.f32 %v91_v29, %v89_v33  ;;  %v96_v39 = vmul.f32 %v92_v30, %v89_v33  ;;  %v97_v40 = vmul.f32 %v93_v31, %v89_v33 }
  0xac   :  { %v106_v45 = vmul.f32 %v98_v32, %v94_v37  ;;  %v107_v46 = vmul.f32 %v99_v34, %v95_v38  ;;  %v108_v47 = vmul.f32 %v100_v35, %v96_v39  ;;  %v109_v48 = vmul.f32 %v101_v36, %v97_v40 }
  0xae   :  { %v110_v49 = vadd.f32 %v106_v45, %v102_v41  ;;  %v111_v50 = vadd.f32 %v107_v46, %v103_v42  ;;  %v112_v51 = vadd.f32 %v108_v47, %v104_v43  ;;  %v113_v52 = vadd.f32 %v109_v48, %v105_v44 }
  0xb0   :  { %v114_v53 = vmax.f32 %v110_v49, 0.0  ;;  %v115_v54 = vmax.f32 %v111_v50, 0.0  ;;  %v116_v55 = vmax.f32 %v112_v51, 0.0  ;;  %v117_v56 = vmax.f32 %v113_v52, 0.0 }
  0xb2   :  { %118 = vst [vmem:[#allocation8] sm:$0xff] %v114_v53 }
  0xb3   :  { %119 = vst [vmem:[#allocation8 + $0x8] sm:$0xff] %v115_v54 }
  0xb4   :  { %120 = vst [vmem:[#allocation8 + $0x10] sm:$0xff] %v116_v55 }
  0xb5   :  { %121 = vst [vmem:[#allocation8 + $0x18] sm:$0xff] %v117_v56 }
  0xb6   :  { %132 = dma.vmem_to_hbm [thread:$0]  %s128_s2, 512, %s130_s28, [#allocation4]  }
  0xb7   :  { %246 = dma.done.wait [#allocation4], 512  }
  0xb8   :  { %247 = vsyncadd [#allocation4], 4294966784 }
  0xb9   :  { %137 = vsyncpa [#allocation3], 1 }
  0xba   :  { %138 = vsyncpa [#allocation6], 1 }
  0xbb   :  { %139 = vsyncpa [#allocation4], 1 }

</bundles_post_ra>
